<compile_context>
chip_gen: v7x
topology: tpu7x:2x2x1
jax: 0.10.0
libtpu: 0.0.40
codegen_flags: <defaults>
</compile_context>

<pallas_src>
import jax
import jax.numpy as jnp
from jax.experimental import pallas as pl
from jax.experimental.pallas import tpu as pltpu


# ---------------------------------------------------------------------------
# Kernel
# ---------------------------------------------------------------------------
def _quant_linear_kernel(inp_ref, wdn_ref, dlt_ref, x_ref, bias_ref, o_ref):
    """One (tm, tn) output tile, accumulated in-place over the K grid axis.

    inp_ref  : (tm, tk)  bf16   input tile
    wdn_ref  : (tn, tk)  bf16   cached round_down(W)
    dlt_ref  : (tn, tk)  bf16   cached round_up(W) - round_down(W)
    x_ref    : (tn, tk)  bf16   interpolation parameter
    bias_ref : (1,  tn)  f32
    o_ref    : (tm, tn)  f32    output tile, doubles as the f32 accumulator
                                (K-invariant out BlockSpec -> resident in VMEM)
    """
    k = pl.program_id(2)

    @pl.when(k == 0)
    def _():
        o_ref[...] = jnp.zeros_like(o_ref)

    # Dequant / interpolation in f32 on the VPU: Wq = w_down + x * (w_up - w_down)
    wq = (wdn_ref[...].astype(jnp.float32)
          + x_ref[...].astype(jnp.float32) * dlt_ref[...].astype(jnp.float32))
    wq = wq.astype(jnp.bfloat16)                                   # (tn, tk)

    # input @ Wq.T without an explicit transpose: contract both operands on K.
    o_ref[...] += jax.lax.dot_general(
        inp_ref[...], wq,
        dimension_numbers=(((1,), (1,)), ((), ())),
        preferred_element_type=jnp.float32)                        # (tm, tn)

    @pl.when(k == pl.num_programs(2) - 1)
    def _():
        o_ref[...] += bias_ref[...]


# ---------------------------------------------------------------------------
# Wrapper
# ---------------------------------------------------------------------------
def _pick_tile(dim, candidates):
    """Largest candidate that evenly tiles `dim`; fall back to the full dim."""
    for t in candidates:
        if t <= dim and dim % t == 0:
            return t
    return dim


def quantized_linear_forward(inp, w_down, delta, x, bias, *,
                             tm=256, tn=512, tk=512):
    """inp: (..., K); w_down/delta/x: (N, K); bias: (N,). Returns (..., N) f32."""
    *lead, K = inp.shape
    N = w_down.shape[0]
    M = 1
    for d in lead:
        M *= d

    # Lane-dense, MXU-friendly tiles; fall back to the full dim for tiny shapes.
    tm = _pick_tile(M, (tm, 512, 256, 128, 64, 32, 16, 8))
    tn = _pick_tile(N, (tn, 512, 256, 128))
    tk = _pick_tile(K, (tk, 512, 256, 128))

    inp2d = inp.reshape(M, K).astype(jnp.bfloat16)
    w_down = w_down.astype(jnp.bfloat16)
    delta = delta.astype(jnp.bfloat16)
    x = x.astype(jnp.bfloat16)
    bias2d = bias.reshape(1, N).astype(jnp.float32)

    grid = (M // tm, N // tn, K // tk)   # reduction axis (K) last

    out2d = pl.pallas_call(
        _quant_linear_kernel,
        out_shape=jax.ShapeDtypeStruct((M, N), jnp.float32),
        grid=grid,
        in_specs=[
            pl.BlockSpec((tm, tk), lambda m, n, k: (m, k)),   # input
            pl.BlockSpec((tn, tk), lambda m, n, k: (n, k)),   # w_down
            pl.BlockSpec((tn, tk), lambda m, n, k: (n, k)),   # delta
            pl.BlockSpec((tn, tk), lambda m, n, k: (n, k)),   # x
            pl.BlockSpec((1, tn), lambda m, n, k: (0, n)),    # bias
        ],
        out_specs=pl.BlockSpec((tm, tn), lambda m, n, k: (m, n)),
        compiler_params=pltpu.CompilerParams(
            dimension_semantics=("parallel", "parallel", "arbitrary")),
    )(inp2d, w_down, delta, x, bias2d)

    return out2d.reshape(*lead, N)


# ---------------------------------------------------------------------------
# Init-time GroupFinite analogue (cached round_down / round_up)
# ---------------------------------------------------------------------------
def make_group_grid_cached(weight, wbits, groupsize):
    """Per-(row, group) uniform min/max grid; returns cached w_down and
    delta = round_up(W) - round_down(W), both shaped like W."""
    N, K = weight.shape
    assert K % groupsize == 0
    levels = float(2 ** wbits - 1)
    wg = weight.reshape(N, K // groupsize, groupsize).astype(jnp.float32)
    gmin = jnp.min(wg, axis=-1, keepdims=True)
    gmax = jnp.max(wg, axis=-1, keepdims=True)
    scale = (gmax - gmin) / levels
    zero = gmin
    safe_s = jnp.where(scale == 0.0, 1.0, scale)
    q = (wg - zero) / safe_s
    w_down = jnp.where(scale == 0.0, wg,
                       zero + jnp.clip(jnp.floor(q), 0.0, levels) * scale)
    w_up = jnp.where(scale == 0.0, wg,
                     zero + jnp.clip(jnp.ceil(q), 0.0, levels) * scale)
    return w_down.reshape(N, K), (w_up - w_down).reshape(N, K)


# ---------------------------------------------------------------------------
# Pure-JAX reference (same bf16 operand quantization, f32 accumulation)
# ---------------------------------------------------------------------------
def reference_forward(inp2d, w_down, delta, x, bias):
    inp_b = inp2d.astype(jnp.bfloat16)
    wq = (w_down.astype(jnp.bfloat16).astype(jnp.float32)
          + x.astype(jnp.bfloat16).astype(jnp.float32)
          * delta.astype(jnp.bfloat16).astype(jnp.float32)).astype(jnp.bfloat16)
    out = jax.lax.dot_general(inp_b, wq,
                              dimension_numbers=(((1,), (1,)), ((), ())),
                              preferred_element_type=jnp.float32)
    return out + bias.reshape(1, -1).astype(jnp.float32)


def _run_case(key, batch, seq, in_features, out_features, wbits, groupsize, **tiles):
    k_in, k_w, k_x, k_b = jax.random.split(key, 4)
    inp = jax.random.normal(k_in, (batch, seq, in_features), dtype=jnp.float32)
    weight = jax.random.normal(k_w, (out_features, in_features), dtype=jnp.float32)
    # args.init_x == 'rand': x ~ U[0, 1), same shape as weight
    x = jax.random.uniform(k_x, (out_features, in_features), dtype=jnp.float32)
    bias = 0.1 * jax.random.normal(k_b, (out_features,), dtype=jnp.float32)

    # Init-time quantization grid (GroupFinite with cache_down/cache_up).
    w_down, delta = make_group_grid_cached(weight, wbits, groupsize)

    out = quantized_linear_forward(inp, w_down, delta, x, bias, **tiles)
    out = jax.block_until_ready(out)

    ref = reference_forward(inp.reshape(-1, in_features), w_down, delta, x, bias)
    ref = ref.reshape(batch, seq, out_features)

    assert out.shape == (batch, seq, out_features)
    assert jnp.allclose(out, ref, atol=1e-2, rtol=1e-2), "mismatch vs JAX reference"


if __name__ == "__main__":
    key = jax.random.PRNGKey(0)
    k0, k1 = jax.random.split(key)

    # Small shapes consistent with the module: linear layer on (batch, seq, in).
    _run_case(k0, batch=2, seq=8, in_features=64, out_features=256,
              wbits=4, groupsize=16)

    # Second case exercises the K-reduction grid axis (tk=128 -> 2 K steps).
    _run_case(k1, batch=2, seq=8, in_features=256, out_features=256,
              wbits=4, groupsize=16, tk=128)

    print("KERNEL_OK")
</pallas_src>

<mosaic_0001>
module attributes {stable_mosaic.version = 11 : i64} {
  func.func @_quant_linear_kernel(%arg0: i32, %arg1: i32, %arg2: i32, %arg3: memref<16x64xbf16, #tpu.memory_space<vmem>>, %arg4: memref<256x64xbf16, #tpu.memory_space<vmem>>, %arg5: memref<256x64xbf16, #tpu.memory_space<vmem>>, %arg6: memref<256x64xbf16, #tpu.memory_space<vmem>>, %arg7: memref<1x256xf32, #tpu.memory_space<vmem>>, %arg8: memref<16x256xf32, #tpu.memory_space<vmem>>) attributes {dimension_semantics = [#tpu.dimension_semantics<parallel>, #tpu.dimension_semantics<parallel>, #tpu.dimension_semantics<arbitrary>], iteration_bounds = array<i64: 1, 1, 1>, scalar_prefetch = 0 : i64, scratch_operands = 0 : i64, tpu.core_type = #tpu.core_type<tc>, window_params = [{transform_indices = @transform_0, window_bounds = array<i64: 16, 64>}, {transform_indices = @transform_1, window_bounds = array<i64: 256, 64>}, {transform_indices = @transform_2, window_bounds = array<i64: 256, 64>}, {transform_indices = @transform_3, window_bounds = array<i64: 256, 64>}, {transform_indices = @transform_4, window_bounds = array<i64: 1, 256>}, {transform_indices = @transform_5, window_bounds = array<i64: 16, 256>}]} {
    %c0_i32 = arith.constant 0 : i32
    %0 = arith.cmpi eq, %arg2, %c0_i32 : i32
    %1 = arith.extui %0 : i1 to i32
    %c0_i32_0 = arith.constant 0 : i32
    %2 = arith.cmpi ne, %1, %c0_i32_0 : i32
    scf.if %2 {
      %cst_14 = arith.constant 0.000000e+00 : f32
      %20 = vector.broadcast %cst_14 : f32 to vector<16x256xf32>
      %c0_15 = arith.constant 0 : index
      %c0_16 = arith.constant 0 : index
      %21 = vector.load %arg8[%c0_15, %c0_16] : memref<16x256xf32, #tpu.memory_space<vmem>>, vector<16x256xf32>
      tpu.vector_store %arg8[%c0_15, %c0_16], %20 {strides = array<i32>} : memref<16x256xf32, #tpu.memory_space<vmem>>, vector<16x256xf32>,
    } else {
    }
    %c0 = arith.constant 0 : index
    %c0_1 = arith.constant 0 : index
    %3 = vector.load %arg4[%c0, %c0_1] : memref<256x64xbf16, #tpu.memory_space<vmem>>, vector<256x64xbf16>
    %4 = arith.extf %3 : vector<256x64xbf16> to vector<256x64xf32>
    %c0_2 = arith.constant 0 : index
    %c0_3 = arith.constant 0 : index
    %5 = vector.load %arg6[%c0_2, %c0_3] : memref<256x64xbf16, #tpu.memory_space<vmem>>, vector<256x64xbf16>
    %6 = arith.extf %5 : vector<256x64xbf16> to vector<256x64xf32>
    %c0_4 = arith.constant 0 : index
    %c0_5 = arith.constant 0 : index
    %7 = vector.load %arg5[%c0_4, %c0_5] : memref<256x64xbf16, #tpu.memory_space<vmem>>, vector<256x64xbf16>
    %8 = arith.extf %7 : vector<256x64xbf16> to vector<256x64xf32>
    %9 = arith.mulf %6, %8 : vector<256x64xf32>
    %10 = arith.addf %4, %9 : vector<256x64xf32>
    %11 = arith.truncf %10 : vector<256x64xf32> to vector<256x64xbf16>
    %c0_6 = arith.constant 0 : index
    %c0_7 = arith.constant 0 : index
    %12 = vector.load %arg8[%c0_6, %c0_7] : memref<16x256xf32, #tpu.memory_space<vmem>>, vector<16x256xf32>
    %c0_8 = arith.constant 0 : index
    %c0_9 = arith.constant 0 : index
    %13 = vector.load %arg3[%c0_8, %c0_9] : memref<16x64xbf16, #tpu.memory_space<vmem>>, vector<16x64xbf16>
    %cst = arith.constant dense<0.000000e+00> : vector<16x256xf32>
    %14 = tpu.matmul %13, %11, %cst {dimension_numbers = #tpu.dot_dimension_numbers<[1], [1], [0], [0], [0, 0, 1, 0], [], []>} : vector<16x64xbf16>, vector<256x64xbf16>, vector<16x256xf32> -> vector<16x256xf32>
    %15 = arith.addf %12, %14 : vector<16x256xf32>
    %c0_10 = arith.constant 0 : index
    %c0_11 = arith.constant 0 : index
    %16 = vector.load %arg8[%c0_10, %c0_11] : memref<16x256xf32, #tpu.memory_space<vmem>>, vector<16x256xf32>
    tpu.vector_store %arg8[%c0_10, %c0_11], %15 {strides = array<i32>} : memref<16x256xf32, #tpu.memory_space<vmem>>, vector<16x256xf32>,
    %c0_i32_12 = arith.constant 0 : i32
    %17 = arith.cmpi eq, %arg2, %c0_i32_12 : i32
    %18 = arith.extui %17 : i1 to i32
    %c0_i32_13 = arith.constant 0 : i32
    %19 = arith.cmpi ne, %18, %c0_i32_13 : i32
    scf.if %19 {
      %c0_14 = arith.constant 0 : index
      %c0_15 = arith.constant 0 : index
      %20 = vector.load %arg8[%c0_14, %c0_15] : memref<16x256xf32, #tpu.memory_space<vmem>>, vector<16x256xf32>
      %c0_16 = arith.constant 0 : index
      %c0_17 = arith.constant 0 : index
      %21 = vector.load %arg7[%c0_16, %c0_17] : memref<1x256xf32, #tpu.memory_space<vmem>>, vector<1x256xf32>
      %22 = vector.broadcast %21 : vector<1x256xf32> to vector<16x256xf32>
      %23 = arith.addf %20, %22 : vector<16x256xf32>
      %c0_18 = arith.constant 0 : index
      %c0_19 = arith.constant 0 : index
      %24 = vector.load %arg8[%c0_18, %c0_19] : memref<16x256xf32, #tpu.memory_space<vmem>>, vector<16x256xf32>
      tpu.vector_store %arg8[%c0_18, %c0_19], %23 {strides = array<i32>} : memref<16x256xf32, #tpu.memory_space<vmem>>, vector<16x256xf32>,
    } else {
    }
    return
  }
  func.func @transform_0(%arg0: i32, %arg1: i32, %arg2: i32) -> (i32, i32) {
    %c0_i32 = arith.constant 0 : i32
    return %arg0, %arg2 : i32, i32
  }
  func.func @transform_1(%arg0: i32, %arg1: i32, %arg2: i32) -> (i32, i32) {
    %c0_i32 = arith.constant 0 : i32
    return %arg1, %arg2 : i32, i32
  }
  func.func @transform_2(%arg0: i32, %arg1: i32, %arg2: i32) -> (i32, i32) {
    %c0_i32 = arith.constant 0 : i32
    return %arg1, %arg2 : i32, i32
  }
  func.func @transform_3(%arg0: i32, %arg1: i32, %arg2: i32) -> (i32, i32) {
    %c0_i32 = arith.constant 0 : i32
    return %arg1, %arg2 : i32, i32
  }
  func.func @transform_4(%arg0: i32, %arg1: i32, %arg2: i32) -> (i32, i32) {
    %c0_i32 = arith.constant 0 : i32
    %c0_i32_0 = arith.constant 0 : i32
    return %c0_i32, %arg1 : i32, i32
  }
  func.func @transform_5(%arg0: i32, %arg1: i32, %arg2: i32) -> (i32, i32) {
    %c0_i32 = arith.constant 0 : i32
    return %arg0, %arg1 : i32, i32
  }
}

</mosaic_0001>

<bundles_post_ra>
// kernel: tpu_custom_call.1
= control target key start
LH: loop header
LB: loop body
LE: loop exit
PB: predicated region body
PF: predicated region fallthrough
CT: control target
= control target key end

     0   :  { %vm313_vm0 = vcmask 523264   ;;  %s970_s0 = inlined_call_operand.vmem [shape: bf16[16,64], index: 0, kind: input, shape index: {}]   ;;  %s971_s1 = inlined_call_operand.vmem [shape: bf16[256,64], index: 1, kind: input, shape index: {}]   ;;  %s972_s2 = inlined_call_operand.vmem [shape: bf16[256,64], index: 2, kind: input, shape index: {}]   ;;  %s973_s3 = inlined_call_operand.vmem [shape: bf16[256,64], index: 3, kind: input, shape index: {}]   ;;  %s974_s4 = inlined_call_operand.vmem [shape: f32[1,256], index: 4, kind: input, shape index: {}]   ;;  %s975_s5 = inlined_call_operand.hbm [shape: f32[16,256], index: 5, kind: output, shape index: {}]  }
   0x1   :  { %v660_v0 = vld [vmem:[%s971_s1 + $0x40] sm:$0xff]   ;;  %v661_v14 = vld [vmem:[%s971_s1 + $0x48] sm:$0xff]   ;;  %v662_v40 = vld [vmem:[%s971_s1 + $0x50] sm:$0xff]  }
   0x2   :  { %v675_v1 = vld [vmem:[%s973_s3 + $0x40] sm:$0xff]   ;;  %v495_v3 = vunpack.c.l.bf16 %v660_v0  ;;  %v496_v4 = vunpack.c.h.bf16 %v660_v0  ;;  %v676_v15 = vld [vmem:[%s973_s3 + $0x48] sm:$0xff]   ;;  %v499_v23 = vunpack.c.l.bf16 %v661_v14  ;;  %v500_v24 = vunpack.c.h.bf16 %v661_v14  ;;  %v677_v45 = vld [vmem:[%s973_s3 + $0x50] sm:$0xff]  }
   0x3   :  { %v690_v2 = vld [vmem:[%s972_s2 + $0x40] sm:$0xff]   ;;  %v559_v5 = vunpack.c.l.bf16 %v675_v1  ;;  %v560_v6 = vunpack.c.h.bf16 %v675_v1  ;;  %v691_v20 = vld [vmem:[%s972_s2 + $0x48] sm:$0xff]   ;;  %v563_v28 = vunpack.c.l.bf16 %v676_v15  ;;  %v564_v29 = vunpack.c.h.bf16 %v676_v15  ;;  %v692_v50 = vld [vmem:[%s972_s2 + $0x50] sm:$0xff]  }
   0x4   :  { %v462_v7 = vld [vmem:[%s971_s1] sm:$0xff]   ;;  %v623_v10 = vunpack.c.l.bf16 %v690_v2  ;;  %v624_v11 = vunpack.c.h.bf16 %v690_v2  ;;  %v653_v25 = vld [vmem:[%s971_s1 + $0x8] sm:$0xff]   ;;  %v627_v33 = vunpack.c.l.bf16 %v691_v20  ;;  %v628_v34 = vunpack.c.h.bf16 %v691_v20  ;;  %v654_v55 = vld [vmem:[%s971_s1 + $0x10] sm:$0xff]  }
   0x5   :  { %v526_v8 = vld [vmem:[%s973_s3] sm:$0xff]   ;;  %v463_v12 = vunpack.c.l.bf16 %v462_v7  ;;  %v464_v13 = vunpack.c.h.bf16 %v462_v7  ;;  %v668_v30 = vld [vmem:[%s973_s3 + $0x8] sm:$0xff]   ;;  %v467_v38 = vunpack.c.l.bf16 %v653_v25  ;;  %v468_v39 = vunpack.c.h.bf16 %v653_v25  ;;  %v669_v60 = vld [vmem:[%s973_s3 + $0x10] sm:$0xff]  }
   0x6   :  { %v590_v9 = vld [vmem:[%s972_s2] sm:$0xff]   ;;  %v527_v16 = vunpack.c.l.bf16 %v526_v8  ;;  %v528_v17 = vunpack.c.h.bf16 %v526_v8  ;;  %v238_v21 = vmul.f32 %v623_v10, %v559_v5  ;;  %v239_v22 = vmul.f32 %v624_v11, %v560_v6  ;;  %v683_v35 = vld [vmem:[%s972_s2 + $0x8] sm:$0xff]   ;;  %v684_v1 = vld [vmem:[%s972_s2 + $0x10] sm:$0xff]  }
   0x7   :  { %v591_v18 = vunpack.c.l.bf16 %v590_v9  ;;  %v592_v19 = vunpack.c.h.bf16 %v590_v9  ;;  %v240_v42 = vmul.f32 %v627_v33, %v563_v28  ;;  %v241_v43 = vmul.f32 %v628_v34, %v564_v29  ;;  %v663_v5 = vld [vmem:[%s971_s1 + $0x58] sm:$0xff]  }
   0x8   :  { %v270_v31 = vadd.f32 %v495_v3, %v238_v21  ;;  %v271_v32 = vadd.f32 %v496_v4, %v239_v22  ;;  %v531_v44 = vunpack.c.l.bf16 %v668_v30  ;;  %v532_v47 = vunpack.c.h.bf16 %v668_v30  ;;  %v678_v6 = vld [vmem:[%s973_s3 + $0x58] sm:$0xff]   ;;  %v861_v22 = vld [vmem:[%s970_s0] sm:$0xff]  }
   0x9   :  { %v222_v26 = vmul.f32 %v591_v18, %v527_v16  ;;  %v223_v27 = vmul.f32 %v592_v19, %v528_v17  ;;  %v595_v48 = vunpack.c.l.bf16 %v683_v35  ;;  %v596_v49 = vunpack.c.h.bf16 %v683_v35  ;;  %v693_v15 = vld [vmem:[%s972_s2 + $0x58] sm:$0xff]  }
   0xa   :  { %v294_v41 = vpack.c.bf16 %v271_v32, %v270_v31  ;;  %v272_v51 = vadd.f32 %v499_v23, %v240_v42  ;;  %v273_v52 = vadd.f32 %v500_v24, %v241_v43  ;;  %v503_v53 = vunpack.c.l.bf16 %v662_v40  ;;  %v655_v16 = vld [vmem:[%s971_s1 + $0x18] sm:$0xff]  }
   0xb   :  { %v254_v36 = vadd.f32 %v463_v12, %v222_v26  ;;  %v255_v37 = vadd.f32 %v464_v13, %v223_v27  ;;  %v504_v54 = vunpack.c.h.bf16 %v662_v40  ;;  %v224_v57 = vmul.f32 %v595_v48, %v531_v44  ;;  %v670_v17 = vld [vmem:[%s973_s3 + $0x18] sm:$0xff]  }
   0xc   :  { %716 = vmatprep.subr.msk.bf16.mxu0 %vm313_vm0, %v294_v41  ;;  %v225_v58 = vmul.f32 %v596_v49, %v532_v47  ;;  %v567_v59 = vunpack.c.l.bf16 %v677_v45  ;;  %v295_v61 = vpack.c.bf16 %v273_v52, %v272_v51  ;;  %v568_v62 = vunpack.c.h.bf16 %v677_v45  ;;  %v685_v27 = vld [vmem:[%s972_s2 + $0x18] sm:$0xff]  }
   0xd   :  { %v286_v46 = vpack.c.bf16 %v255_v37, %v254_v36  ;;  %v631_v63 = vunpack.c.l.bf16 %v692_v50  ;;  %v632_v0 = vunpack.c.h.bf16 %v692_v50  ;;  %v256_v2 = vadd.f32 %v467_v38, %v224_v57 }
   0xe   :  { %v257_v3 = vadd.f32 %v468_v39, %v225_v58  ;;  %v471_v4 = vunpack.c.l.bf16 %v654_v55  ;;  %v535_v9 = vunpack.c.l.bf16 %v669_v60  ;;  %v536_v10 = vunpack.c.h.bf16 %v669_v60 }
   0xf   :  { %v318_v56 = vsel %vm313_vm0, %v286_v46, 0  ;;  %v242_v7 = vmul.f32 %v631_v63, %v567_v59  ;;  %v243_v8 = vmul.f32 %v632_v0, %v568_v62  ;;  %v472_v12 = vunpack.c.h.bf16 %v654_v55 }
  0x10   :  { %699 = vmatpush3.bf16.xpose.msra.mxu0 %v318_v56  ;;  %v287_v11 = vpack.c.bf16 %v257_v3, %v256_v2  ;;  %v599_v13 = vunpack.c.l.bf16 %v684_v1  ;;  %v600_v14 = vunpack.c.h.bf16 %v684_v1  ;;  %v507_v20 = vunpack.c.l.bf16 %v663_v5 }
  0x11   :  { %717 = vmatprep.subr.msk.bf16.mxu0 %vm313_vm0, %v295_v61  ;;  %v274_v18 = vadd.f32 %v503_v53, %v242_v7  ;;  %v275_v19 = vadd.f32 %v504_v54, %v243_v8  ;;  %v571_v21 = vunpack.c.l.bf16 %v678_v6  ;;  %v572_v26 = vunpack.c.h.bf16 %v678_v6 }
  0x12   :  { %v321_v23 = vsel %vm313_vm0, %v287_v11, 0  ;;  %v226_v24 = vmul.f32 %v599_v13, %v535_v9  ;;  %v227_v25 = vmul.f32 %v600_v14, %v536_v10 }
  0x13   :  { %10 = vsyncpa [#allocation3], 0  ;;  %v296_v28 = vpack.c.bf16 %v275_v19, %v274_v18  ;;  %v508_v29 = vunpack.c.h.bf16 %v663_v5  ;;  %v635_v30 = vunpack.c.l.bf16 %v693_v15  ;;  %v636_v31 = vunpack.c.h.bf16 %v693_v15  ;;  %714 = vmatprep.mubr.msk.bf16.mxu0 %vm313_vm0, %v861_v22  ;;  %v679_v36 = vld [vmem:[%s973_s3 + $0x60] sm:$0xff]   ;;  %v680_v5 = vld [vmem:[%s973_s3 + $0x68] sm:$0xff]  }
  0x14   :  { %v258_v32 = vadd.f32 %v471_v4, %v226_v24  ;;  %v259_v33 = vadd.f32 %v472_v12, %v227_v25  ;;  %v475_v34 = vunpack.c.l.bf16 %v655_v16  ;;  %v539_v35 = vunpack.c.l.bf16 %v670_v17  ;;  %v664_v41 = vld [vmem:[%s971_s1 + $0x60] sm:$0xff]   ;;  %v695_v6 = vld [vmem:[%s972_s2 + $0x68] sm:$0xff]  }
  0x15   :  { %v244_v37 = vmul.f32 %v635_v30, %v571_v21  ;;  %v245_v38 = vmul.f32 %v636_v31, %v572_v26  ;;  %v540_v39 = vunpack.c.h.bf16 %v670_v17  ;;  %v603_v40 = vunpack.c.l.bf16 %v685_v27  ;;  %v694_v42 = vld [vmem:[%s972_s2 + $0x60] sm:$0xff]   ;;  %v665_v14 = vld [vmem:[%s971_s1 + $0x68] sm:$0xff]   ;;  %v681_v31 = vld [vmem:[%s973_s3 + $0x70] sm:$0xff]  }
  0x16   :  { %v288_v43 = vpack.c.bf16 %v259_v33, %v258_v32  ;;  %v476_v44 = vunpack.c.h.bf16 %v655_v16  ;;  %v604_v45 = vunpack.c.h.bf16 %v685_v27  ;;  %v575_v49 = vunpack.c.l.bf16 %v679_v36  ;;  %v671_v50 = vld [vmem:[%s973_s3 + $0x20] sm:$0xff]   ;;  %v672_v15 = vld [vmem:[%s973_s3 + $0x28] sm:$0xff]   ;;  %v696_v32 = vld [vmem:[%s972_s2 + $0x70] sm:$0xff]  }
  0x17   :  { %v276_v46 = vadd.f32 %v507_v20, %v244_v37  ;;  %v277_v47 = vadd.f32 %v508_v29, %v245_v38  ;;  %v228_v48 = vmul.f32 %v603_v40, %v539_v35  ;;  %v511_v52 = vunpack.c.l.bf16 %v664_v41  ;;  %v686_v55 = vld [vmem:[%s972_s2 + $0x20] sm:$0xff]   ;;  %v687_v20 = vld [vmem:[%s972_s2 + $0x28] sm:$0xff]  }
  0x18   :  { %701 = vmatpush3.bf16.xpose.msra.mxu0 %v321_v23  ;;  %v229_v51 = vmul.f32 %v604_v45, %v540_v39  ;;  %v576_v53 = vunpack.c.h.bf16 %v679_v36  ;;  %v639_v54 = vunpack.c.l.bf16 %v694_v42  ;;  %v324_v56 = vsel %vm313_vm0, %v288_v43, 0  ;;  %v656_v60 = vld [vmem:[%s971_s1 + $0x20] sm:$0xff]   ;;  %v657_v25 = vld [vmem:[%s971_s1 + $0x28] sm:$0xff]  }
  0x19   :  { %718 = vmatprep.subr.msk.bf16.mxu0 %vm313_vm0, %v296_v28  ;;  %v260_v57 = vadd.f32 %v475_v34, %v228_v48  ;;  %v512_v58 = vunpack.c.h.bf16 %v664_v41  ;;  %v640_v59 = vunpack.c.h.bf16 %v694_v42  ;;  %v297_v61 = vpack.c.bf16 %v277_v47, %v276_v46  ;;  %v666_v41 = vld [vmem:[%s971_s1 + $0x70] sm:$0xff]  }
  0x1a   :  { %v261_v62 = vadd.f32 %v476_v44, %v229_v51  ;;  %v246_v63 = vmul.f32 %v639_v54, %v575_v49  ;;  %v543_v0 = vunpack.c.l.bf16 %v671_v50  ;;  %v544_v2 = vunpack.c.h.bf16 %v671_v50  ;;  %v673_v49 = vld [vmem:[%s973_s3 + $0x30] sm:$0xff]  }
  0x1b   :  { %v247_v1 = vmul.f32 %v640_v59, %v576_v53  ;;  %v607_v3 = vunpack.c.l.bf16 %v686_v55  ;;  %v608_v4 = vunpack.c.h.bf16 %v686_v55  ;;  %v479_v8 = vunpack.c.l.bf16 %v656_v60  ;;  %v688_v50 = vld [vmem:[%s972_s2 + $0x30] sm:$0xff]  }
  0x1c   :  { %v289_v7 = vpack.c.bf16 %v261_v62, %v260_v57  ;;  %v480_v9 = vunpack.c.h.bf16 %v656_v60  ;;  %v278_v10 = vadd.f32 %v511_v52, %v246_v63  ;;  %v579_v16 = vunpack.c.l.bf16 %v680_v5  ;;  %v658_v57 = vld [vmem:[%s971_s1 + $0x30] sm:$0xff]  }
  0x1d   :  { %v279_v11 = vadd.f32 %v512_v58, %v247_v1  ;;  %v230_v12 = vmul.f32 %v607_v3, %v543_v0  ;;  %v231_v13 = vmul.f32 %v608_v4, %v544_v2  ;;  %v580_v17 = vunpack.c.h.bf16 %v680_v5  ;;  %v682_v0 = vld [vmem:[%s973_s3 + $0x78] sm:$0xff]  }
  0x1e   :  { %v643_v18 = vunpack.c.l.bf16 %v695_v6  ;;  %v644_v19 = vunpack.c.h.bf16 %v695_v6  ;;  %v327_v21 = vsel %vm313_vm0, %v289_v7, 0  ;;  %v515_v23 = vunpack.c.l.bf16 %v665_v14  ;;  %v697_v1 = vld [vmem:[%s972_s2 + $0x78] sm:$0xff]  }
  0x1f   :  { %v516_v24 = vunpack.c.h.bf16 %v665_v14  ;;  %v547_v26 = vunpack.c.l.bf16 %v672_v15  ;;  %v298_v27 = vpack.c.bf16 %v279_v11, %v278_v10  ;;  %v548_v28 = vunpack.c.h.bf16 %v672_v15  ;;  %v674_v14 = vld [vmem:[%s973_s3 + $0x38] sm:$0xff]   ;;  %s753_s3 = smov [#allocation2]  }
  0x20   :  { %703 = vmatpush3.bf16.xpose.msra.mxu0 %v324_v56  ;;  %v611_v29 = vunpack.c.l.bf16 %v687_v20  ;;  %v612_v30 = vunpack.c.h.bf16 %v687_v20  ;;  %v262_v33 = vadd.f32 %v479_v8, %v230_v12  ;;  %v263_v34 = vadd.f32 %v480_v9, %v231_v13  ;;  %v667_v9 = vld [vmem:[%s971_s1 + $0x78] sm:$0xff]   ;;  %s448_s14 = sshll.u32 %s753_s3, 4  ;;  %s449_s14 = int_to_ptr.vmem [resolvable:$true] %s448_s14 }
  0x21   :  { %719 = vmatprep.subr.msk.bf16.mxu0 %vm313_vm0, %v297_v61  ;;  %v248_v35 = vmul.f32 %v643_v18, %v579_v16  ;;  %v249_v36 = vmul.f32 %v644_v19, %v580_v17  ;;  %v483_v37 = vunpack.c.l.bf16 %v657_v25  ;;  %v484_v38 = vunpack.c.h.bf16 %v657_v25  ;;  %v689_v15 = vld [vmem:[%s972_s2 + $0x38] sm:$0xff]   ;;  %s729_s15 = scalar_lea.vmem %s449_s14, 512  ;;  %p734_p1 = scmp.lt.s32.totalorder %s449_s14, %s449_s14 }
  0x22   :  { %v232_v39 = vmul.f32 %v611_v29, %v547_v26  ;;  %v233_v40 = vmul.f32 %v612_v30, %v548_v28  ;;  %v583_v42 = vunpack.c.l.bf16 %v681_v31  ;;  %v584_v43 = vunpack.c.h.bf16 %v681_v31  ;;  %v659_v26 = vld [vmem:[%s971_s1 + $0x38] sm:$0xff]   ;;  %p730_p0 = scmp.ne.s32.totalorder %s449_s14, %s729_s15  ;;  %p735_p2 = scmp.lt.s32.totalorder %s729_s15, %s729_s15 }
  0x23   :  { %v647_v44 = vunpack.c.l.bf16 %v696_v32  ;;  %v648_v45 = vunpack.c.h.bf16 %v696_v32  ;;  %v290_v46 = vpack.c.bf16 %v263_v34, %v262_v33  ;;  %v280_v47 = vadd.f32 %v515_v23, %v248_v35 }
  0x24   :  { %v281_v48 = vadd.f32 %v516_v24, %v249_v36  ;;  %v519_v51 = vunpack.c.l.bf16 %v666_v41  ;;  %v520_v52 = vunpack.c.h.bf16 %v666_v41  ;;  %v264_v53 = vadd.f32 %v483_v37, %v232_v39  ;;  %p736_p3 = por %p735_p2, %p734_p1 }
  0x25   :  { %v265_v54 = vadd.f32 %v484_v38, %v233_v40  ;;  %v250_v55 = vmul.f32 %v647_v44, %v583_v42  ;;  %v251_v56 = vmul.f32 %v648_v45, %v584_v43  ;;  %v551_v58 = vunpack.c.l.bf16 %v673_v49 }
  0x26   :  { %v552_v59 = vunpack.c.h.bf16 %v673_v49  ;;  %v615_v60 = vunpack.c.l.bf16 %v688_v50  ;;  %v616_v61 = vunpack.c.h.bf16 %v688_v50  ;;  %v330_v62 = vsel %vm313_vm0, %v290_v46, 0  ;;  %v423_v46 = vld [vmem:[%s974_s4] sm:$0x3]  ;;  %p737_p4 = pnand %p736_p3, %p730_p0 }
  0x27   :  { %v299_v63 = vpack.c.bf16 %v281_v48, %v280_v47  ;;  %v487_v2 = vunpack.c.l.bf16 %v658_v57  ;;  %v291_v3 = vpack.c.bf16 %v265_v54, %v264_v53  ;;  %v282_v4 = vadd.f32 %v519_v51, %v250_v55 }
  0x28   :  { %705 = vmatpush3.bf16.xpose.msra.mxu0 %v327_v21  ;;  %v283_v5 = vadd.f32 %v520_v52, %v251_v56  ;;  %v488_v6 = vunpack.c.h.bf16 %v658_v57  ;;  %v234_v7 = vmul.f32 %v615_v60, %v551_v58  ;;  %v235_v8 = vmul.f32 %v616_v61, %v552_v59 }
  0x29   :  { %720 = vmatprep.subr.msk.bf16.mxu0 %vm313_vm0, %v298_v27  ;;  %v587_v10 = vunpack.c.l.bf16 %v682_v0  ;;  %v651_v11 = vunpack.c.l.bf16 %v697_v1  ;;  %v588_v12 = vunpack.c.h.bf16 %v682_v0  ;;  %v652_v13 = vunpack.c.h.bf16 %v697_v1 }
  0x2a   :  { %v333_v16 = vsel %vm313_vm0, %v291_v3, 0  ;;  %v300_v17 = vpack.c.bf16 %v283_v5, %v282_v4  ;;  %v523_v18 = vunpack.c.l.bf16 %v667_v9  ;;  %v524_v19 = vunpack.c.h.bf16 %v667_v9 }
  0x2b   :  { %v266_v20 = vadd.f32 %v487_v2, %v234_v7  ;;  %v267_v21 = vadd.f32 %v488_v6, %v235_v8  ;;  %v252_v23 = vmul.f32 %v651_v11, %v587_v10  ;;  %v555_v24 = vunpack.c.l.bf16 %v674_v14 }
  0x2c   :  { %v253_v25 = vmul.f32 %v652_v13, %v588_v12  ;;  %v556_v27 = vunpack.c.h.bf16 %v674_v14  ;;  %v619_v28 = vunpack.c.l.bf16 %v689_v15  ;;  %v620_v29 = vunpack.c.h.bf16 %v689_v15 }
  0x2d   :  { %v292_v30 = vpack.c.bf16 %v267_v21, %v266_v20  ;;  %v491_v31 = vunpack.c.l.bf16 %v659_v26  ;;  %v492_v32 = vunpack.c.h.bf16 %v659_v26  ;;  %v284_v33 = vadd.f32 %v523_v18, %v252_v23 }
  0x2e   :  { %v285_v34 = vadd.f32 %v524_v19, %v253_v25  ;;  %v236_v35 = vmul.f32 %v619_v28, %v555_v24  ;;  %v237_v36 = vmul.f32 %v620_v29, %v556_v27  ;;  %v425_v43 = vlaneseq }
  0x2f   :  { %v336_v37 = vsel %vm313_vm0, %v292_v30, 0 }
  0x30   :  { %707 = vmatpush3.bf16.xpose.msra.mxu0 %v330_v62  ;;  %v301_v38 = vpack.c.bf16 %v285_v34, %v284_v33  ;;  %v268_v39 = vadd.f32 %v491_v31, %v236_v35  ;;  %v269_v40 = vadd.f32 %v492_v32, %v237_v36  ;;  %v426_v44 = vshrl.u32 %v425_v43, 7 }
  0x31   :  { %721 = vmatprep.subr.msk.bf16.mxu0 %vm313_vm0, %v299_v63 }
  0x32   :  { %v293_v41 = vpack.c.bf16 %v269_v40, %v268_v39  ;;  %v427_v45 = vsub.s32 0, %v426_v44  ;;  %v431_v47 = vsub.s32 1, %v426_v44 }
  0x34   :  { %v339_v42 = vsel %vm313_vm0, %v293_v41, 0  ;;  %v428_v48 = vrot.slane %v423_v46, %v427_v45  ;;  %v432_v50 = vrot.slane %v423_v46, %v431_v47 }
  0x38   :  { %709 = vmatpush3.bf16.xpose.msra.mxu0 %v333_v16 }
  0x39   :  { %722 = vmatprep.subr.msk.bf16.mxu0 %vm313_vm0, %v300_v17 }
  0x40   :  { %711 = vmatpush3.bf16.xpose.msra.mxu0 %v336_v37 }
  0x41   :  { %723 = vmatprep.subr.msk.bf16.mxu0 %vm313_vm0, %v301_v38 }
  0x48   :  { %713 = vmatpush3.bf16.xpose.msra.mxu0 %v339_v42 }
  0x4f   :  { %715 = vmatmul.mubr.msk.bf16.vlgmr.msra.gmra.mrb[0].mxu0 %vm313_vm0, %v861_v22 }
 0x122   :  { %v399_v49 = vpop.f32.mrb[0].mxu0 }
 0x123   :  { %v401_v51 = vpop.f32.mrb[1].mxu0  ;;  %v435_v53 = vadd.f32 %v428_v48, %v399_v49 }
 0x124   :  { %v403_v52 = vpop.f32.mrb[2].mxu0  ;;  %v436_v55 = vadd.f32 %v432_v50, %v401_v51 }
 0x125   :  { %v405_v54 = vpop.f32.mrb[3].mxu0  ;;  %439 = vst [vmem:[#allocation2] sm:$0xff] %v435_v53  ;;  %v437_v22 = vadd.f32 %v428_v48, %v403_v52 }
 0x126   :  { %440 = vst [vmem:[#allocation2 + $0x8] sm:$0xff] %v436_v55  ;;  %v438_v56 = vadd.f32 %v432_v50, %v405_v54 }
 0x127   :  { %441 = vst [vmem:[#allocation2 + $0x10] sm:$0xff] %v437_v22 }
 0x128   :  { %442 = vst [vmem:[#allocation2 + $0x18] sm:$0xff] %v438_v56 }
 0x129   :  { %740 = shalt.err (!%p737_p4)
}
 0x12a   :  { %s741_s17 = scalar_lea.hbm %s975_s5, 512 }
 0x12b   :  { %p742_p5 = scmp.ne.s32.totalorder %s975_s5, %s741_s17  ;;  %p745_p6 = scmp.lt.u32.totalorder %s741_s17, %s975_s5 }
 0x12d   :  { %p747_p7 = pnand %p745_p6, %p742_p5 }
 0x12f   :  { %750 = shalt.err (!%p747_p7)
}
 0x130   :  { %s754_s21 = smov 256   ;;  %s755_s22 = smov 16  }
 0x131   :  { %454 = dma.vmem_to_hbm [thread:$0]  %s449_s14, 512, %s975_s5, [#allocation3], %s754_s21, %s754_s21, %s755_s22  }
 0x132   :  { %751 = dma.done.wait [#allocation3], 512  }
 0x133   :  { %752 = vsyncadd [#allocation3], 4294966784 }
 0x134   :  { %458 = vsyncpa [#allocation3], 1 }

</bundles_post_ra>
